<compile_context>
chip_gen: v7x
topology: tpu7x:2x2x1
jax: 0.10.0
libtpu: 0.0.40
codegen_flags: <defaults>
</compile_context>

<pallas_src>
import numpy as np
import jax
import jax.numpy as jnp
from jax.experimental import pallas as pl
from jax.experimental.pallas import tpu as pltpu

_SUB = 8                      # f32 sublanes per vreg tile
_LANE = 128                   # lanes per vreg tile
_UNIT = _SUB * _LANE          # 1024 elements = one full (8, 128) f32 tile
_TARGET_BLOCK_ELEMS = 256 * 1024   # ~1 MiB f32 per x / out block


def _baird_kernel(x_ref, c_ref, o_ref):
    # x_ref: (TB, TFB, 8, 128); c_ref: (1, TFB, 8, 128) -> broadcasts over TB.
    x = x_ref[...].astype(jnp.float32)
    c = c_ref[...].astype(jnp.float32)

    e_x = jnp.exp(x)
    e_nx = jnp.exp(-x)
    u = c + 0.5 * (e_x - e_nx)                  # c + sinh(x)
    au = jnp.abs(u)
    t = jnp.log(au + jnp.sqrt(au * au + 1.0))   # asinh(|u|), cancellation-free
    y = jnp.where(u < 0.0, -t, t)               # sign(u) * asinh(|u|)
    o_ref[...] = y.astype(o_ref.dtype)


def baird_activation_forward(x, c):
    """x: (B, *layer_shape); c: (1, *layer_shape). Returns same shape/dtype as x."""
    assert x.shape[1:] == c.shape[1:]
    assert c.shape[0] == 1
    B = x.shape[0]
    F = int(np.prod(x.shape[1:]))

    x2 = x.reshape(B, F)
    c2 = c.reshape(1, F)

    # --- tiling choices ----------------------------------------------------
    # Batch tile: largest of (8, 4, 2, 1) that divides B.
    TB = next(t for t in (8, 4, 2, 1) if B % t == 0)

    FB0 = pl.cdiv(F, _UNIT)                     # number of (8,128) feature tiles
    # Feature-tile-group size: target ~1 MiB of f32 per x block.
    TFB = max(1, min(FB0, _TARGET_BLOCK_ELEMS // (TB * _UNIT)))
    # Give the v7x megacore (2 TCs) at least two parallel grid steps if possible.
    if (B // TB) * pl.cdiv(FB0, TFB) < 2:
        if FB0 >= 2:
            TFB = pl.cdiv(FB0, 2)
        elif TB > 1:
            TB = TB // 2

    FB = pl.cdiv(FB0, TFB) * TFB                # pad #feature-tiles to multiple of TFB
    F_pad = FB * _UNIT

    if F_pad != F:
        # zero padding is harmless (c=0, x=0 -> y=0) and is sliced off below
        x2 = jnp.pad(x2, ((0, 0), (0, F_pad - F)))
        c2 = jnp.pad(c2, ((0, 0), (0, F_pad - F)))

    # Fold features into full (8,128) vreg tiles -> 100% sublane occupancy.
    x4 = x2.reshape(B, FB, _SUB, _LANE)
    c4 = c2.reshape(1, FB, _SUB, _LANE)

    grid = (B // TB, FB // TFB)

    out = pl.pallas_call(
        _baird_kernel,
        out_shape=jax.ShapeDtypeStruct((B, FB, _SUB, _LANE), x.dtype),
        grid_spec=pltpu.PrefetchScalarGridSpec(
            num_scalar_prefetch=0,
            grid=grid,
            in_specs=[
                pl.BlockSpec((TB, TFB, _SUB, _LANE), lambda i, j: (i, j, 0, 0)),
                pl.BlockSpec((1, TFB, _SUB, _LANE), lambda i, j: (0, j, 0, 0)),
            ],
            out_specs=pl.BlockSpec((TB, TFB, _SUB, _LANE),
                                   lambda i, j: (i, j, 0, 0)),
        ),
        compiler_params=pltpu.CompilerParams(
            dimension_semantics=("parallel", "parallel"),
        ),
    )(x4, c4)

    out2 = out.reshape(B, F_pad)
    if F_pad != F:
        out2 = out2[:, :F]
    return out2.reshape(x.shape)


def _reference_f64(x, c):
    """Faithful float64 numpy evaluation of the original PyTorch formulation."""
    x = np.asarray(x, dtype=np.float64)
    c = np.asarray(c, dtype=np.float64)
    ta = 0.5 + c * np.exp(-x) - np.exp(-2.0 * x) / 2.0
    tb = -0.5 + c * np.exp(x) + np.exp(2.0 * x) / 2.0
    return np.where(
        c > 0.0,
        x + np.log(ta + np.sqrt(np.exp(-2.0 * x) + ta * ta)),
        x - np.log(-tb + np.sqrt(np.exp(2.0 * x) + tb * tb)),
    )


if __name__ == "__main__":
    key = jax.random.PRNGKey(0)
    kx, kc = jax.random.split(key)

    # layer_shape = (C, H, W) = (4, 16, 16); batch = 2
    B, C, H, W = 2, 4, 16, 16
    x = jax.random.normal(kx, (B, C, H, W), dtype=jnp.float32)
    # Module's __init__ uses zeros for c; use small deterministic values here
    # so both sign regions of the activation are exercised.
    c = 0.5 * jax.random.normal(kc, (1, C, H, W), dtype=jnp.float32)

    y = baird_activation_forward(x, c)
    y = jax.block_until_ready(y)

    y_ref = _reference_f64(np.asarray(x), np.asarray(c))
    np.testing.assert_allclose(np.asarray(y, dtype=np.float64), y_ref,
                               rtol=1e-4, atol=1e-4)
    print("KERNEL_OK")
</pallas_src>

<mosaic_0001>
module attributes {stable_mosaic.version = 11 : i64} {
  func.func @_baird_kernel(%arg0: i32, %arg1: i32, %arg2: memref<1x1x8x128xf32, #tpu.memory_space<vmem>>, %arg3: memref<1x1x8x128xf32, #tpu.memory_space<vmem>>, %arg4: memref<1x1x8x128xf32, #tpu.memory_space<vmem>>) attributes {dimension_semantics = [#tpu.dimension_semantics<parallel>, #tpu.dimension_semantics<parallel>], iteration_bounds = array<i64: 2, 1>, scalar_prefetch = 0 : i64, scratch_operands = 0 : i64, tpu.core_type = #tpu.core_type<tc>, window_params = [{transform_indices = @transform_0, window_bounds = array<i64: 1, 1, 8, 128>}, {transform_indices = @transform_1, window_bounds = array<i64: 1, 1, 8, 128>}, {transform_indices = @transform_2, window_bounds = array<i64: 1, 1, 8, 128>}]} {
    %c0 = arith.constant 0 : index
    %c0_0 = arith.constant 0 : index
    %c0_1 = arith.constant 0 : index
    %c0_2 = arith.constant 0 : index
    %0 = vector.load %arg2[%c0, %c0_0, %c0_1, %c0_2] : memref<1x1x8x128xf32, #tpu.memory_space<vmem>>, vector<1x1x8x128xf32>
    %c0_3 = arith.constant 0 : index
    %c0_4 = arith.constant 0 : index
    %c0_5 = arith.constant 0 : index
    %c0_6 = arith.constant 0 : index
    %1 = vector.load %arg3[%c0_3, %c0_4, %c0_5, %c0_6] : memref<1x1x8x128xf32, #tpu.memory_space<vmem>>, vector<1x1x8x128xf32>
    %2 = math.exp %0 : vector<1x1x8x128xf32>
    %cst = arith.constant 0.000000e+00 : f32
    %3 = vector.broadcast %cst : f32 to vector<1x1x8x128xf32>
    %4 = arith.subf %3, %0 : vector<1x1x8x128xf32>
    %5 = math.exp %4 : vector<1x1x8x128xf32>
    %6 = arith.subf %2, %5 : vector<1x1x8x128xf32>
    %cst_7 = arith.constant 5.000000e-01 : f32
    %7 = vector.broadcast %cst_7 : f32 to vector<1x1x8x128xf32>
    %8 = arith.mulf %7, %6 : vector<1x1x8x128xf32>
    %9 = arith.addf %1, %8 : vector<1x1x8x128xf32>
    %10 = math.absf %9 : vector<1x1x8x128xf32>
    %11 = arith.mulf %10, %10 : vector<1x1x8x128xf32>
    %cst_8 = arith.constant 1.000000e+00 : f32
    %12 = vector.broadcast %cst_8 : f32 to vector<1x1x8x128xf32>
    %13 = arith.addf %11, %12 : vector<1x1x8x128xf32>
    %14 = math.sqrt %13 : vector<1x1x8x128xf32>
    %15 = arith.addf %10, %14 : vector<1x1x8x128xf32>
    %16 = math.log %15 : vector<1x1x8x128xf32>
    %cst_9 = arith.constant 0.000000e+00 : f32
    %17 = vector.broadcast %cst_9 : f32 to vector<1x1x8x128xf32>
    %18 = arith.cmpf olt, %9, %17 : vector<1x1x8x128xf32>
    %cst_10 = arith.constant 0.000000e+00 : f32
    %19 = vector.broadcast %cst_10 : f32 to vector<1x1x8x128xf32>
    %20 = arith.subf %19, %16 : vector<1x1x8x128xf32>
    %21 = arith.select %18, %20, %16 : vector<1x1x8x128xi1>, vector<1x1x8x128xf32>
    %c0_11 = arith.constant 0 : index
    %c0_12 = arith.constant 0 : index
    %c0_13 = arith.constant 0 : index
    %c0_14 = arith.constant 0 : index
    %22 = vector.load %arg4[%c0_11, %c0_12, %c0_13, %c0_14] : memref<1x1x8x128xf32, #tpu.memory_space<vmem>>, vector<1x1x8x128xf32>
    tpu.vector_store %arg4[%c0_11, %c0_12, %c0_13, %c0_14], %21 {strides = array<i32>} : memref<1x1x8x128xf32, #tpu.memory_space<vmem>>, vector<1x1x8x128xf32>,
    return
  }
  func.func @transform_0(%arg0: i32, %arg1: i32) -> (i32, i32, i32, i32) {
    %c0_i32 = arith.constant 0 : i32
    %c0_i32_0 = arith.constant 0 : i32
    %c0_i32_1 = arith.constant 0 : i32
    return %arg0, %arg1, %c0_i32, %c0_i32_0 : i32, i32, i32, i32
  }
  func.func @transform_1(%arg0: i32, %arg1: i32) -> (i32, i32, i32, i32) {
    %c0_i32 = arith.constant 0 : i32
    %c0_i32_0 = arith.constant 0 : i32
    %c0_i32_1 = arith.constant 0 : i32
    %c0_i32_2 = arith.constant 0 : i32
    return %c0_i32, %arg1, %c0_i32_0, %c0_i32_1 : i32, i32, i32, i32
  }
  func.func @transform_2(%arg0: i32, %arg1: i32) -> (i32, i32, i32, i32) {
    %c0_i32 = arith.constant 0 : i32
    %c0_i32_0 = arith.constant 0 : i32
    %c0_i32_1 = arith.constant 0 : i32
    return %arg0, %arg1, %c0_i32, %c0_i32_0 : i32, i32, i32, i32
  }
}

</mosaic_0001>

<bundles_post_ra>
// kernel: tpu_custom_call.1
= control target key start
LH: loop header
LB: loop body
LE: loop exit
PB: predicated region body
PF: predicated region fallthrough
CT: control target
= control target key end

     0   :  { %7 = vsyncpa [#allocation3], 0  ;;  %s810_s0 = inlined_call_operand.hbm [shape: f32[2,1,8,128], index: 0, kind: input, shape index: {}]   ;;  %s811_s1 = inlined_call_operand.hbm [shape: f32[1,1,8,128], index: 1, kind: input, shape index: {}]   ;;  %s812_s2 = inlined_call_operand.hbm [shape: f32[2,1,8,128], index: 2, kind: output, shape index: {}]  }
   0x1   :  { %9 = vsyncpa [#allocation3 + $0x1], 0 }
   0x2   :  { %10 = vsyncpa [#allocation6], 0 }
   0x3   :  { %11 = vsyncpa [#allocation4], 0 }
   0x4   :  { %13 = vsyncpa [#allocation4 + $0x1], 0  ;;  %s590_s9 = smov 0   ;;  %s592_s10 = smov 0  }
   0x5   :  { %s594_s11 = smov 0   ;;  %s596_s12 = smov 0  }
   0x6   :  { %s598_s13 = smov 0   ;;  %s600_s14 = smov 0  }
   0x7 LB: > { %s330_s15 = sadd.s32 4294967295, %s570_s14   ;;  %s331_s16 = sadd.s32 4294967294, %s570_s14   ;;  %s570_s14 = sphi %s600_s14, %s19_s14   ;;  %s566_s13 = sphi %s598_s13, %s837_s13   ;;  %s562_s12 = sphi %s596_s12, %s836_s12   ;;  %s558_s11 = sphi %s594_s11, %s835_s11   ;;  %s554_s10 = sphi %s592_s10, %s834_s10   ;;  %s550_s9 = sphi %s590_s9, %s833_s9  }
   0x8   : > { %p53_p0 = scmp.ne.s32.totalorder %s554_s10, %s550_s9  ;;  %p624_p1 = scmp.eq.s32.totalorder %s330_s15, 0 }
   0x9   : > { %p628_p2 = scmp.eq.s32.totalorder %s330_s15, 1  ;;  %p111_p3 = scmp.eq.s32.totalorder %s331_s16, 1 }
   0xa   : > { %s817_s17 = scalar_select %p624_p1, 1, 0 }
   0xb   : > { %s818_s18 = scalar_select %p628_p2, 1, 0 }
   0xc   : > { %p634_p4 = por %p624_p1, %p53_p0  ;;  %p332_p5 = scmp.ge.s32.totalorder %s570_s14, 1 }
   0xd   : > { %p639_p6 = por %p111_p3, %p53_p0  ;;  %p118_p7 = scmp.lt.s32.totalorder %s570_s14, 3 }
   0xe   : > { %s819_s19 = scalar_select %p634_p4, 1, 0 }
   0xf   : > { %s820_s20 = scalar_select %p639_p6, 1, 0 }
  0x10   : > { %p644_p8 = pnand %p332_p5, %p118_p7  ;;  %s572_s22 = smov [#allocation5]  }
  0x11   : > { %s133_s23 = sshll.u32 %s572_s22, 4  ;;  %s31_s25 = sadd.s32 1, %s566_s13  ;;  %s134_s23 = int_to_ptr.vmem [resolvable:$true] %s133_s23 }
  0x12   : > { %s821_s21 = scalar_select %p644_p8, 1, 0 }
  0x13   : > { %p353_p10 = pneg %p644_p8  ;;  %s40_s26 = sadd.s32 1, %s558_s11 }
  0x14   : > { %p659_p12 = scmp.ge.s32.totalorder %s31_s25, 2  ;;  %s426_s30 = scalar_lea.hbm %s811_s1, 128 }
  0x15   : > { %p653_p11 = pnand %p353_p10, %p624_p1  ;;  %p427_p13 = scmp.ne.s32.totalorder %s811_s1, %s426_s30 }
  0x16   : > { %s823_s27 = scalar_select %p659_p12, 1, 0 }
  0x17   : > { %p428_p0 = pneg %p653_p11  ;;  %p433_p7 = scmp.lt.u32.totalorder %s426_s30, %s811_s1 }
  0x19   : > { %p429_p3 = pnand %p428_p0, %p427_p13 }
  0x1b   : > { %p430_p5 = pneg %p429_p3 }
  0x1d   : > { %p435_p10 = pnand %p433_p7, %p430_p5 }
  0x1f   : > { %438 = shalt.err (!%p435_p10)
}
  0x20   : > { %s439_s7 = scalar_lea.vmem %s134_s23, 128  ;;  %p447_p4 = scmp.lt.s32.totalorder %s134_s23, %s134_s23 }
  0x21   : > { %p440_p9 = scmp.ne.s32.totalorder %s134_s23, %s439_s7  ;;  %p448_p8 = scmp.lt.s32.totalorder %s439_s7, %s439_s7 }
  0x23   : > { %p442_p6 = pnand %p440_p9, %p428_p0  ;;  %p449_p2 = por %p448_p8, %p447_p4 }
  0x25   : > { %p443_p1 = pneg %p442_p6 }
  0x27   : > { %p450_p12 = pnand %p449_p2, %p443_p1 }
  0x29   : > { %453 = shalt.err (!%p450_p12)
}
  0x2a   : > { %356 = dma.hbm_to_vmem [thread:$0]  (!%p653_p11), %s811_s1, 128, %s134_s23, [#allocation6]  }
  0x2b   : > { %p824_p4 = scmp.ne.s32.totalorder %s823_s27, 0  ;;  %p47_p1 = scmp.ne.s32.totalorder %s558_s11, %s554_s10 }
  0x2c   : > { %p48_p2 = scmp.eq.s32.totalorder %s570_s14, 0  ;;  %p366_p6 = scmp.lt.s32.totalorder %s570_s14, 2 }
  0x2d   : > { %s839_s25 = smov (%p824_p4, %s31_s25), 0  ;;  %p825_p12 = scmp.ne.s32.totalorder %s818_s18, 0 }
  0x2e   : > { %s35_s16 = ssub.s32 %s566_s13, %s839_s25  ;;  %p49_p9 = por %p48_p2, %p47_p1 }
  0x2f   : > { %p38_p8 = scmp.eq.s32.totalorder %s35_s16, 0  ;;  %p691_p13 = por %p825_p12, %p47_p1 }
  0x30   : > { %s144_s24 = sand.u32 1, %s558_s11   ;;  %s336_s27 = sshll.u32 %s566_s13, 7 }
  0x31   : > { %s699_s28 = scalar_select %p38_p8, %s558_s11, %s40_s26  }
  0x32   : > { %s335_s23 = sshll.u32 %s144_s24, 3  ;;  %s705_s3 = scalar_lea.hbm %s810_s0, %s336_s27 }
  0x33   : > { %s148_s18 = scalar_lea.vmem [#allocation2], %s335_s23  ;;  %p709_p11 = pnand %p366_p6, %p49_p9 }
  0x34   : > { %s156_s4 = sshll.u32 %s148_s18, 4  ;;  %s145_s26 = scalar_lea.sflag [#allocation3], %s144_s24  ;;  %s707_s4 = int_to_ptr.vmem [resolvable:$true] %s156_s4 }
  0x35   : > { %s454_s6 = scalar_lea.hbm %s705_s3, 128  ;;  %p456_p3 = pneg %p709_p11 }
  0x36   : > { %p455_p0 = scmp.ne.s32.totalorder %s705_s3, %s454_s6  ;;  %s459_s15 = scalar_lea.hbm %s810_s0, 256 }
  0x37   : > { %p460_p10 = scmp.lt.u32.totalorder %s705_s3, %s810_s0  ;;  %p461_p4 = scmp.lt.u32.totalorder %s459_s15, %s454_s6 }
  0x38   : > { %p457_p5 = pnand %p456_p3, %p455_p0  ;;  %p463_p2 = scmp.lt.u32.totalorder %s454_s6, %s705_s3 }
  0x39   : > { %p462_p1 = por %p461_p4, %p460_p10 }
  0x3a   : > { %p458_p7 = pneg %p457_p5 }
  0x3b   : > { %p464_p6 = por %p463_p2, %p462_p1 }
  0x3d   : > { %p465_p8 = pnand %p464_p6, %p458_p7 }
  0x3f   : > { %468 = shalt.err (!%p465_p8)
}
  0x40   : > { %s469_s24 = scalar_lea.vmem %s707_s4, 128  ;;  %s573_s27 = smov [#allocation2]  }
  0x41   : > { %p470_p9 = scmp.ne.s32.totalorder %s707_s4, %s469_s24  ;;  %s474_s29 = sshll.u32 %s573_s27, 4  ;;  %s475_s29 = int_to_ptr.vmem [resolvable:$false] %s474_s29 }
  0x42   : > { %s476_s30 = scalar_lea.vmem %s475_s29, 256  ;;  %p477_p5 = scmp.lt.s32.totalorder %s707_s4, %s475_s29 }
  0x43   : > { %p472_p12 = pnand %p470_p9, %p456_p3  ;;  %p478_p10 = scmp.lt.s32.totalorder %s476_s30, %s469_s24 }
  0x45   : > { %p473_p0 = pneg %p472_p12  ;;  %p479_p4 = por %p478_p10, %p477_p5 }
  0x47   : > { %p480_p1 = pnand %p479_p4, %p473_p0 }
  0x49   : > { %483 = shalt.err (!%p480_p1)
}
  0x4a   : > { %360 = dma.hbm_to_vmem [thread:$0]  (!%p709_p11), %s705_s3, 128, %s707_s4, %s145_s26  }
  0x4b   : > { %p828_p7 = scmp.ne.s32.totalorder %s821_s21, 0 }
  0x4c   : > { %s741_s18 = sand.u32 (!%p828_p7), 1, %s554_s10   ;;  %p829_p3 = scmp.ne.s32.totalorder (!%p828_p7), %s819_s19, 0 }
  0x4d   : > { %165 = sbr.rel (%p828_p7) target bundleno = 163 (0xa3), region = 28  ;;  %s338_s6 = sshll.u32 (!%p828_p7), %s741_s18, 3 }
  0x4e   : > { %s168_s7 = scalar_lea.sflag (!%p828_p7), [#allocation3], %s741_s18  ;;  %s171_s8 = scalar_lea.vmem (!%p828_p7), [#allocation2], %s338_s6 }
  0x54   : > { %537 = dma.done.wait (%p829_p3), %s168_s7, 128  }
  0x55   : > { %539 = vsyncadd (%p829_p3), %s168_s7, 4294967168  ;;  %p830_p11 = scmp.ne.s32.totalorder %s817_s17, 0 }
  0x57   : > { %541 = dma.done.wait (%p830_p11), [#allocation6], 128  }
  0x58   : > { %543 = vsyncadd (%p830_p11), [#allocation6], 4294967168  ;;  %v196_v0 = vld [vmem:[%s171_s8] sm:$0xff]  ;;  %v197_v7 = vld [vmem:[#allocation5] sm:$0xff]  ;;  %s195_s17 = scalar_lea.vmem [#allocation7], %s338_s6  ;;  %s342_s21 = sshll.u32 %s562_s12, 7 }
  0x59   : > { %v198_v1 = vmul.f32 1.442695, %v196_v0  ;;  %v200_v2 = vsub.f32 0.0, %v196_v0  ;;  %s238_s19 = sshll.u32 %s195_s17, 4  ;;  %s763_s5 = scalar_lea.hbm %s812_s2, %s342_s21  ;;  %s758_s19 = int_to_ptr.vmem [resolvable:$true] %s238_s19 }
  0x5a   : > { %s224_s26 = scalar_lea.sflag [#allocation4], %s741_s18  ;;  %s484_s15 = scalar_lea.vmem %s758_s19, 128 }
  0x5b   : > { %418 = vpow2.f32 %v198_v1  ;;  %v201_v3 = vmul.f32 1.442695, %v200_v2  ;;  %p485_p2 = scmp.ne.s32.totalorder %s758_s19, %s484_s15  ;;  %s574_s12 = smov [#allocation7]  }
  0x5c   : > { %s488_s16 = sshll.u32 %s574_s12, 4  ;;  %s489_s16 = int_to_ptr.vmem [resolvable:$false] %s488_s16 }
  0x5d   : > { %420 = vpow2.f32 %v201_v3  ;;  %p486_p6 = pnand %p485_p2, %p691_p13  ;;  %s490_s23 = scalar_lea.vmem %s489_s16, 256 }
  0x5e   : > { %p491_p9 = scmp.lt.s32.totalorder %s758_s19, %s489_s16  ;;  %p492_p12 = scmp.lt.s32.totalorder %s490_s23, %s484_s15 }
  0x5f   : > { %p487_p8 = pneg %p486_p6 }
  0x60   : > { %p493_p0 = por %p492_p12, %p491_p9 }
  0x62   : > { %p494_p5 = pnand %p493_p0, %p487_p8 }
  0x65   : > { %v419_v4 = vpop.eup %418 }
  0x67   : > { %v421_v5 = vpop.eup %420 }
  0x68   : > { %v203_v6 = vsub.f32 %v419_v4, %v421_v5 }
  0x6a   : > { %v204_v8 = vmul.f32 0.5, %v203_v6 }
  0x6c   : > { %v205_v9 = vadd.f32 %v204_v8, %v197_v7 }
  0x6e   : > { %v206_v10 = vand.u32 2147483647, %v205_v9  ;;  %vm219_vm2 = vcmp.lt.f32.partialorder %v205_v9, 0.0 }
  0x70   : > { %v207_v11 = vmul.f32 %v206_v10, %v206_v10 }
  0x72   : > { %v208_v12 = vadd.f32 1.0, %v207_v11 }
  0x74   : > { %422 = vrsqrt.f32 %v208_v12  ;;  %vm211_vm0 = vcmp.eq.f32.partialorder %v208_v12, inf  ;;  %v214_v14 = vand.u32 2147483648, %v208_v12  ;;  %vm213_vm1 = vcmp.eq.f32.partialorder %v208_v12, 0.0 }
  0x7e   : > { %v423_v13 = vpop.eup %422 }
  0x7f   : > { %v210_v15 = vmul.f32 %v423_v13, %v208_v12 }
  0x81   : > { %v212_v16 = vsel %vm211_vm0, %v208_v12, %v210_v15 }
  0x82   : > { %v215_v17 = vsel %vm213_vm1, %v214_v14, %v212_v16 }
  0x83   : > { %v216_v18 = vadd.f32 %v215_v17, %v206_v10 }
  0x85   : > { %424 = vlog2.f32 %v216_v18 }
  0x8f   : > { %v425_v19 = vpop.eup %424 }
  0x90   : > { %v218_v20 = vmul.f32 0.6931472, %v425_v19 }
  0x92   : > { %v220_v21 = vsub.f32 0.0, %v218_v20 }
  0x94   : > { %v221_v22 = vsel %vm219_vm2, %v220_v21, %v218_v20 }
  0x95   : > { %222 = vst [vmem:[%s195_s17] sm:$0xff] %v221_v22 }
  0x96   : > { %497 = shalt.err (!%p494_p5)
}
  0x97   : > { %s498_s24 = scalar_lea.hbm %s763_s5, 128  ;;  %s502_s30 = scalar_lea.hbm %s812_s2, 256 }
  0x98   : > { %p499_p10 = scmp.ne.s32.totalorder %s763_s5, %s498_s24  ;;  %p503_p7 = scmp.lt.u32.totalorder %s763_s5, %s812_s2 }
  0x99   : > { %p504_p3 = scmp.lt.u32.totalorder %s502_s30, %s498_s24  ;;  %p506_p2 = scmp.lt.u32.totalorder %s498_s24, %s763_s5 }
  0x9a   : > { %p500_p4 = pnand %p499_p10, %p691_p13 }
  0x9b   : > { %p505_p11 = por %p504_p3, %p503_p7 }
  0x9c   : > { %p501_p1 = pneg %p500_p4 }
  0x9d   : > { %p507_p6 = por %p506_p2, %p505_p11 }
  0x9f   : > { %p508_p8 = pnand %p507_p6, %p501_p1 }
  0xa1   : > { %511 = shalt.err (!%p508_p8)
}
  0xa2   : > { %351 = dma.vmem_to_hbm [thread:$0]  (%p691_p13), %s758_s19, 128, %s763_s5, %s224_s26  }
  0xa3 PF: > { %s250_s7 = sand.u32 1, %s550_s9   ;;  %p831_p9 = scmp.ne.s32.totalorder %s820_s20, 0 }
  0xa4   : > { %p832_p12 = scmp.ge.s32.totalorder %s570_s14, 2  ;;  %s251_s8 = scalar_lea.sflag [#allocation4], %s250_s7 }
  0xa6   : > { %p362_p0 = pnand %p832_p12, %p831_p9 }
  0xa8   : > { %545 = dma.done.wait (!%p362_p0), %s251_s8, 128  }
  0xa9   : > { %547 = vsyncadd (!%p362_p0), %s251_s8, 4294967168  ;;  %s19_s14 = sadd.s32 1, %s570_s14   ;;  %s833_s9 = smov %s554_s10 }
  0xaa   : > { %p16_p5 = scmp.ge.s32.totalorder %s19_s14, 4   ;;  %s834_s10 = smov %s558_s11 }
  0xab   : > { %s835_s11 = smov %s699_s28  ;;  %s836_s12 = smov %s566_s13 }
  0xac   : > { %s837_s13 = smov %s839_s25  ;;  %18 = sbr.rel (!%p16_p5) target bundleno = 7 (0x7), region = 78 }
  0xb3   :  { %256 = vsyncpa [#allocation3], 1 }
  0xb4   :  { %258 = vsyncpa [#allocation3 + $0x1], 1 }
  0xb5   :  { %259 = vsyncpa [#allocation6], 1 }
  0xb6   :  { %260 = vsyncpa [#allocation4], 1 }
  0xb7   :  { %262 = vsyncpa [#allocation4 + $0x1], 1 }

</bundles_post_ra>
